<compile_context>
chip_gen: v5e
topology: v5e:2x2
jax: 0.10.0
libtpu: 0.0.40
codegen_flags: <defaults>
</compile_context>

<pallas_src>
import functools

import numpy as np

import jax
import jax.numpy as jnp
from jax.experimental import pallas as pl
from jax.experimental.pallas import tpu as pltpu


# ---------------------------------------------------------------------------
# Host-side construction of the 1-D interpolation matrices (PyTorch formulas).
# ---------------------------------------------------------------------------
def _interp_matrix(n_in, n_out, mode, align_corners):
    """Returns A (n_out, n_in) float32 so that y = A @ x interpolates along an axis."""
    a = np.zeros((n_out, n_in), dtype=np.float32)
    dst = np.arange(n_out, dtype=np.float64)

    if mode == "nearest":
        src = np.floor(dst * (n_in / n_out)).astype(np.int64)
        src = np.clip(src, 0, n_in - 1)
        a[np.arange(n_out), src] = 1.0
        return a

    if mode not in ("bilinear", "linear"):
        # TODO(synk): bicubic / area / trilinear modes are not implemented.
        raise NotImplementedError(f"mode={mode!r} not supported")

    if n_in == 1:
        a[:, 0] = 1.0
        return a

    if align_corners:
        src = np.zeros(n_out) if n_out == 1 else dst * (n_in - 1) / (n_out - 1)
    else:
        src = (dst + 0.5) * (n_in / n_out) - 0.5
        src = np.clip(src, 0.0, n_in - 1)

    i0 = np.clip(np.floor(src).astype(np.int64), 0, n_in - 1)
    i1 = np.minimum(i0 + 1, n_in - 1)
    w1 = (src - i0).astype(np.float32)
    w0 = (1.0 - w1).astype(np.float32)
    rows = np.arange(n_out)
    np.add.at(a, (rows, i0), w0)
    np.add.at(a, (rows, i1), w1)
    return a


def _pick_tb(n, cap):
    """Largest divisor of n that is <= cap, preferring >= 2 grid steps."""
    cap = max(1, min(cap, n, 4096))
    tb = 1
    for d in range(1, cap + 1):
        if n % d == 0:
            tb = d
    # Prefer at least 2 grid steps so the parallel axis can shard across
    # TensorCores (v7x) instead of serializing onto one core.
    if n >= 2 and n // tb < 2:
        for d in range(n // 2, 0, -1):
            if n % d == 0:
                tb = d
                break
    return tb


# ---------------------------------------------------------------------------
# Pallas kernel
# ---------------------------------------------------------------------------
def _interp_kernel(awt_ref, ah_ref, x_ref, o_ref):
    tb, h_in, w_in = x_ref.shape
    _, h_out, w_out = o_ref.shape

    x = x_ref[...].astype(jnp.float32)        # (TB, Hi, Wi)
    awt = awt_ref[...]                        # (Wi, Wo)  == A_w^T
    ah = ah_ref[...]                          # (Ho, Hi)

    # W-axis interpolation: one plain 2-D MXU matmul (reshape is layout-preserving).
    tmp = jnp.dot(x.reshape(tb * h_in, w_in), awt,
                  preferred_element_type=jnp.float32)       # (TB*Hi, Wo)
    tmp = tmp.reshape(tb, h_in, w_out)

    # H-axis interpolation: batched matmul with the batch axis on both operands
    # (the form Mosaic handles natively, avoiding 3-D relayout transposes).
    ah_b = jnp.broadcast_to(ah, (tb, h_out, h_in))
    out = jax.lax.dot_general(
        ah_b, tmp,
        dimension_numbers=(((2,), (1,)), ((0,), (0,))),
        preferred_element_type=jnp.float32)                 # (TB, Ho, Wo)

    o_ref[...] = out.astype(o_ref.dtype)


# ---------------------------------------------------------------------------
# Wrapper
# ---------------------------------------------------------------------------
def basic_interpolate(x, size, mode="bilinear", align_corners=False):
    """Pallas implementation of BasicInterpolate.forward for x of shape [T,N,C,H,W]."""
    T, N, C, H, W = x.shape
    Ho, Wo = size
    BC = T * N * C
    xb = x.reshape(BC, H, W)

    ah = jnp.asarray(_interp_matrix(H, Ho, mode, align_corners))       # (Ho, H)
    awt = jnp.asarray(_interp_matrix(W, Wo, mode, align_corners).T)    # (W, Wo)

    itemsize = x.dtype.itemsize
    # Tile the batch axis so each block is ~2 MiB (1-4 MiB sweet spot for a
    # bandwidth-bound kernel); TB divides BC exactly so no padded blocks.
    slice_bytes = max(H * W, Ho * Wo) * max(itemsize, 4)
    tb = _pick_tb(BC, max(1, (2 * 1024 * 1024) // slice_bytes))
    grid = (BC // tb,)

    # Explicit VMEM budget: double-buffered in/out blocks + f32 temporaries
    # + interpolation matrices, with headroom; capped below v7x's 64 MiB.
    need = 2 * tb * (H * W + Ho * Wo) * itemsize
    need += tb * (H * W + H * Wo + Ho * Wo + Ho * H) * 4
    need += (Ho * H + W * Wo) * 8
    vmem_limit = int(min(max(2 * need, 16 * 1024 * 1024), 56 * 1024 * 1024))

    cost = pl.CostEstimate(
        flops=2 * BC * (H * W * Wo + Ho * H * Wo),
        transcendentals=0,
        bytes_accessed=BC * (H * W + Ho * Wo) * itemsize + (Ho * H + W * Wo) * 4,
    )

    out = pl.pallas_call(
        _interp_kernel,
        out_shape=jax.ShapeDtypeStruct((BC, Ho, Wo), x.dtype),
        grid_spec=pltpu.PrefetchScalarGridSpec(
            num_scalar_prefetch=0,
            grid=grid,
            in_specs=[
                pl.BlockSpec((W, Wo), lambda b: (0, 0)),
                pl.BlockSpec((Ho, H), lambda b: (0, 0)),
                pl.BlockSpec((tb, H, W), lambda b: (b, 0, 0)),
            ],
            out_specs=pl.BlockSpec((tb, Ho, Wo), lambda b: (b, 0, 0)),
        ),
        compiler_params=pltpu.CompilerParams(
            dimension_semantics=("parallel",),
            vmem_limit_bytes=vmem_limit,
        ),
        cost_estimate=cost,
    )(awt, ah, xb)

    return out.reshape(T, N, C, Ho, Wo)


class BasicInterpolate:
    """Drop-in mirror of the PyTorch module (no learnable parameters)."""

    def __init__(self, size, mode, align_corners):
        self.size = tuple(size)
        self.mode = mode
        self.align_corners = bool(align_corners) if align_corners is not None else False

    def __call__(self, x):
        return basic_interpolate(x, self.size, self.mode, self.align_corners)


# ---------------------------------------------------------------------------
# Pure-JAX reference (gather-based, PyTorch coordinate formulas)
# ---------------------------------------------------------------------------
def basic_interpolate_ref(x, size, mode="bilinear", align_corners=False):
    T, N, C, H, W = x.shape
    Ho, Wo = size
    xb = x.reshape(T * N * C, H, W).astype(jnp.float32)

    def src_coords(n_in, n_out):
        dst = jnp.arange(n_out, dtype=jnp.float32)
        if align_corners:
            if n_out == 1:
                return jnp.zeros((1,), jnp.float32)
            return dst * ((n_in - 1) / (n_out - 1))
        return jnp.clip((dst + 0.5) * (n_in / n_out) - 0.5, 0.0, n_in - 1)

    if mode == "nearest":
        hi = jnp.clip(jnp.floor(jnp.arange(Ho) * (H / Ho)).astype(jnp.int32), 0, H - 1)
        wi = jnp.clip(jnp.floor(jnp.arange(Wo) * (W / Wo)).astype(jnp.int32), 0, W - 1)
        out = xb[:, hi][:, :, wi]
    else:
        sh = src_coords(H, Ho)
        sw = src_coords(W, Wo)
        h0 = jnp.floor(sh).astype(jnp.int32)
        h1 = jnp.minimum(h0 + 1, H - 1)
        w0 = jnp.floor(sw).astype(jnp.int32)
        w1 = jnp.minimum(w0 + 1, W - 1)
        lh = (sh - h0)[None, :, None]
        lw = (sw - w0)[None, None, :]
        top = xb[:, h0][:, :, w0] * (1 - lw) + xb[:, h0][:, :, w1] * lw
        bot = xb[:, h1][:, :, w0] * (1 - lw) + xb[:, h1][:, :, w1] * lw
        out = top * (1 - lh) + bot * lh
    return out.reshape(T, N, C, Ho, Wo).astype(x.dtype)


if __name__ == "__main__":
    T, N, C, H, W = 2, 2, 4, 16, 16
    size = (32, 32)

    key = jax.random.PRNGKey(0)
    x = jax.random.normal(key, (T, N, C, H, W), dtype=jnp.float32)

    # Bilinear upsampling, align_corners=False (typical SLTNet config).
    mod = BasicInterpolate(size=size, mode="bilinear", align_corners=False)
    out = jax.block_until_ready(mod(x))
    ref = basic_interpolate_ref(x, size, mode="bilinear", align_corners=False)
    assert out.shape == ref.shape == (T, N, C, size[0], size[1])
    assert jnp.allclose(out, ref, atol=1e-5, rtol=1e-5), "bilinear/ac=False mismatch"

    # Bilinear with align_corners=True and non-square resize (incl. downsample).
    out2 = jax.block_until_ready(
        basic_interpolate(x, (8, 24), mode="bilinear", align_corners=True))
    ref2 = basic_interpolate_ref(x, (8, 24), mode="bilinear", align_corners=True)
    assert jnp.allclose(out2, ref2, atol=1e-5, rtol=1e-5), "bilinear/ac=True mismatch"

    print("KERNEL_OK")
</pallas_src>

<mosaic_0001>
module attributes {stable_mosaic.version = 11 : i64} {
  func.func @_interp_kernel(%arg0: i32, %arg1: memref<16x32xf32, #tpu.memory_space<vmem>>, %arg2: memref<32x16xf32, #tpu.memory_space<vmem>>, %arg3: memref<8x16x16xf32, #tpu.memory_space<vmem>>, %arg4: memref<8x32x32xf32, #tpu.memory_space<vmem>>) attributes {dimension_semantics = [#tpu.dimension_semantics<parallel>], iteration_bounds = array<i64: 2>, scalar_prefetch = 0 : i64, scratch_operands = 0 : i64, tpu.core_type = #tpu.core_type<tc>, window_params = [{pipeline_mode = #tpu.pipeline_mode<synchronous>, transform_indices = @transform_0, window_bounds = array<i64: 16, 32>}, {pipeline_mode = #tpu.pipeline_mode<synchronous>, transform_indices = @transform_1, window_bounds = array<i64: 32, 16>}, {transform_indices = @transform_2, window_bounds = array<i64: 8, 16, 16>}, {transform_indices = @transform_3, window_bounds = array<i64: 8, 32, 32>}]} {
    %c0 = arith.constant 0 : index
    %c0_0 = arith.constant 0 : index
    %c0_1 = arith.constant 0 : index
    %0 = vector.load %arg3[%c0, %c0_0, %c0_1] : memref<8x16x16xf32, #tpu.memory_space<vmem>>, vector<8x16x16xf32>
    %c0_2 = arith.constant 0 : index
    %c0_3 = arith.constant 0 : index
    %1 = vector.load %arg1[%c0_2, %c0_3] : memref<16x32xf32, #tpu.memory_space<vmem>>, vector<16x32xf32>
    %c0_4 = arith.constant 0 : index
    %c0_5 = arith.constant 0 : index
    %2 = vector.load %arg2[%c0_4, %c0_5] : memref<32x16xf32, #tpu.memory_space<vmem>>, vector<32x16xf32>
    %3 = vector.shape_cast %0 : vector<8x16x16xf32> to vector<128x16xf32>
    %cst = arith.constant dense<0.000000e+00> : vector<128x32xf32>
    %4 = tpu.matmul %3, %1, %cst {dimension_numbers = #tpu.dot_dimension_numbers<[1], [0], [0], [1], [0, 0, 1, 1], [], []>} : vector<128x16xf32>, vector<16x32xf32>, vector<128x32xf32> -> vector<128x32xf32>
    %5 = vector.shape_cast %4 : vector<128x32xf32> to vector<8x16x32xf32>
    %6 = vector.shape_cast %2 : vector<32x16xf32> to vector<1x32x16xf32>
    %7 = vector.broadcast %6 : vector<1x32x16xf32> to vector<8x32x16xf32>
    %cst_6 = arith.constant dense<0.000000e+00> : vector<8x32x32xf32>
    %8 = tpu.matmul %7, %5, %cst_6 {dimension_numbers = #tpu.dot_dimension_numbers<[2], [1], [1], [2], [0, 0, 0, 1, 1, 2], [0], [0]>} : vector<8x32x16xf32>, vector<8x16x32xf32>, vector<8x32x32xf32> -> vector<8x32x32xf32>
    %c0_7 = arith.constant 0 : index
    %c0_8 = arith.constant 0 : index
    %c0_9 = arith.constant 0 : index
    %9 = vector.load %arg4[%c0_7, %c0_8, %c0_9] : memref<8x32x32xf32, #tpu.memory_space<vmem>>, vector<8x32x32xf32>
    tpu.vector_store %arg4[%c0_7, %c0_8, %c0_9], %8 {strides = array<i32>} : memref<8x32x32xf32, #tpu.memory_space<vmem>>, vector<8x32x32xf32>,
    return
  }
  func.func @transform_0(%arg0: i32) -> (i32, i32) {
    %c0_i32 = arith.constant 0 : i32
    %c0_i32_0 = arith.constant 0 : i32
    %c0_i32_1 = arith.constant 0 : i32
    return %c0_i32, %c0_i32_0 : i32, i32
  }
  func.func @transform_1(%arg0: i32) -> (i32, i32) {
    %c0_i32 = arith.constant 0 : i32
    %c0_i32_0 = arith.constant 0 : i32
    %c0_i32_1 = arith.constant 0 : i32
    return %c0_i32, %c0_i32_0 : i32, i32
  }
  func.func @transform_2(%arg0: i32) -> (i32, i32, i32) {
    %c0_i32 = arith.constant 0 : i32
    %c0_i32_0 = arith.constant 0 : i32
    %c0_i32_1 = arith.constant 0 : i32
    return %arg0, %c0_i32, %c0_i32_0 : i32, i32, i32
  }
  func.func @transform_3(%arg0: i32) -> (i32, i32, i32) {
    %c0_i32 = arith.constant 0 : i32
    %c0_i32_0 = arith.constant 0 : i32
    %c0_i32_1 = arith.constant 0 : i32
    return %arg0, %c0_i32, %c0_i32_0 : i32, i32, i32
  }
}

</mosaic_0001>

<bundles_post_ra>
// kernel: tpu_custom_call.1
= control target key start
LH: loop header
LB: loop body
LE: loop exit
PB: predicated region body
PF: predicated region fallthrough
CT: control target
= control target key end

     0   :  { %8 = vsyncpa [#allocation3], 0  ;;  %s1218_s0 = inlined_call_operand.vmem [shape: f32[16,32], index: 0, kind: input, shape index: {}]   ;;  %s1219_s1 = inlined_call_operand.vmem [shape: f32[32,16], index: 1, kind: input, shape index: {}]   ;;  %s1220_s2 = inlined_call_operand.hbm [shape: f32[16,16,16], index: 2, kind: input, shape index: {}]   ;;  %s1221_s3 = inlined_call_operand.hbm [shape: f32[16,32,32], index: 3, kind: output, shape index: {}]  }
   0x1   :  { %10 = vsyncpa [#allocation3 + $0x1], 0 }
   0x2   :  { %11 = vsyncpa [#allocation4], 0 }
   0x3   :  { %13 = vsyncpa [#allocation4 + $0x1], 0  ;;  %s939_s12 = smov 0   ;;  %s941_s13 = smov 0  }
   0x4   :  { %s943_s14 = smov 0   ;;  %s945_s15 = smov 0  }
   0x5 LB: > { %s960_s16 = sadd.s32 4294967295, %s913_s15   ;;  %s697_s17 = sadd.s32 4294967294, %s913_s15   ;;  %s913_s15 = sphi %s945_s15, %s1231_s15   ;;  %s909_s14 = sphi %s943_s14, %s1230_s14   ;;  %s905_s13 = sphi %s941_s13, %s1229_s13   ;;  %s901_s12 = sphi %s939_s12, %s1228_s12  }
   0x6   : > { %s964_s18 = sadd.s32 1, %s913_s15   ;;  %s68_s19 = sadd.s32 1, %s909_s14 }
   0x7   : > { %s65_s20 = ssub.s32 %s913_s15, %s964_s18  ;;  %p75_p0 = scmp.ne.s32.totalorder %s909_s14, %s905_s13 }
   0x8   : > { %p66_p1 = scmp.eq.s32.totalorder %s65_s20, 0  ;;  %p76_p2 = scmp.eq.s32.totalorder %s913_s15, 0 }
   0x9   : > { %p81_p3 = scmp.ne.s32.totalorder %s905_s13, %s901_s12  ;;  %p82_p4 = scmp.eq.s32.totalorder %s960_s16, 0 }
   0xa   : > { %s976_s21 = scalar_select %p66_p1, %s909_s14, %s68_s19  }
   0xb   : > { %p978_p5 = por %p76_p2, %p75_p0  ;;  %p982_p6 = por %p82_p4, %p81_p3 }
   0xc   : > { %p105_p7 = scmp.eq.s32.totalorder %s960_s16, 1  ;;  %p111_p8 = scmp.eq.s32.totalorder %s697_s17, 1 }
   0xd   : > { %p779_p10 = scmp.lt.s32.totalorder %s913_s15, 2  ;;  %s137_s26 = sand.u32 1, %s909_s14  }
   0xe   : > { %p989_p11 = por %p105_p7, %p75_p0  ;;  %p993_p12 = por %p111_p8, %p81_p3 }
   0xf   : > { %s762_s27 = sshll.u32 %s913_s15, 7  ;;  %s700_s28 = sshll.u32 %s137_s26, 7 }
  0x10   : > { %s147_s4 = scalar_lea.hbm %s1220_s2, %s762_s27  ;;  %s141_s6 = scalar_lea.vmem [#allocation2], %s700_s28 }
  0x11   : > { %s148_s5 = sshll.u32 %s147_s4, 4  ;;  %s150_s7 = sshll.u32 %s141_s6, 4  ;;  %s149_s5 = int_to_ptr.hbm [resolvable:$true] %s148_s5  ;;  %s151_s7 = int_to_ptr.vmem [resolvable:$true] %s150_s7 }
  0x12   : > { %p1004_p13 = pnand %p779_p10, %p978_p5  ;;  %p704_p0 = scmp.ge.s32.totalorder %s913_s15, 1 }
  0x13   : > { %p158_p1 = scmp.lt.s32.totalorder %s913_s15, 3  ;;  %s138_s9 = scalar_lea.sflag [#allocation3], %s137_s26 }
  0x14   : > { %s817_s10 = sshra.s32 %s149_s5, 4  ;;  %p821_p3 = pneg %p1004_p13  ;;  %s818_s10 = int_to_ptr.hbm [resolvable:$true] %s817_s10 }
  0x15   : > { %s819_s11 = scalar_lea.hbm %s818_s10, 128  ;;  %s824_s20 = scalar_lea.hbm %s1220_s2, 256 }
  0x16   : > { %p820_p2 = scmp.ne.s32.totalorder %s818_s10, %s819_s11  ;;  %p825_p5 = scmp.lt.s32.totalorder %s818_s10, %s1220_s2 }
  0x17   : > { %p826_p8 = scmp.lt.s32.totalorder %s824_s20, %s819_s11 }
  0x18   : > { %p822_p4 = pnand %p821_p3, %p820_p2 }
  0x19   : > { %p827_p10 = por %p826_p8, %p825_p5 }
  0x1a   : > { %p823_p7 = pneg %p822_p4 }
  0x1c   : > { %p828_p9 = pnand %p827_p10, %p823_p7 }
  0x1e   : > { %831 = shalt.err (!%p828_p9)
}
  0x1f   : > { %s915_s26 = smov 128   ;;  %s916_s28 = smov 8  }
  0x20   : > { %774 = dma.hbm_to_vmem [thread:$0]  (!%p1004_p13), %s149_s5, 2048, %s151_s7, %s138_s9, %s915_s26, %s915_s26, %s916_s28  }
  0x21   : > { %p159_p2 = pnand %p704_p0, %p158_p1 }
  0x22   : > { %s1025_s29 = sand.u32 (!%p159_p2), 1, %s905_s13  }
  0x23   : > { %162 = sbr.rel (%p159_p2) target bundleno = 438 (0x1b6), region = 32  ;;  %s705_s30 = sshll.u32 (!%p159_p2), %s1025_s29, 7 }
  0x24   : > { %s165_s4 = scalar_lea.sflag (!%p159_p2), [#allocation3], %s1025_s29  ;;  %s1029_s6 = scalar_lea.vmem (!%p159_p2), [#allocation2], %s705_s30 }
  0x28   : > { %892 = dma.done.wait (%p982_p6), %s165_s4, 2048  }
  0x29   : > { %894 = vsyncadd (%p982_p6), %s165_s4, 4294965248  ;;  %v211_v0 = vld [vmem:[%s1218_s0 + $0x8] sm:$0xff]  ;;  %v210_v1 = vld [vmem:[%s1218_s0] sm:$0xff]  ;;  %vm216_vm0 = vcmask 130048   ;;  %s706_s26 = sshll.u32 %s1025_s29, 8  ;;  %vm574_vm1 = vcmask 261120  }
  0x2a   : > { %279 = vmatpush.msra.mxu0 %v211_v0  ;;  %v194_v2 = vld [vmem:[%s1029_s6] sm:$0xff]  ;;  %765 = vmatpush.msra.mxu3 %v211_v0  ;;  %v195_v3 = vld [vmem:[%s1029_s6 + $0x8] sm:$0xff]  ;;  %v196_v4 = vld [vmem:[%s1029_s6 + $0x10] sm:$0xff]  ;;  %s1118_s28 = scalar_lea.vmem [#allocation5], %s706_s26  ;;  %s764_s30 = sshll.u32 %s960_s16, 8 }
  0x2b   : > { %v197_v5 = vld [vmem:[%s1029_s6 + $0x18] sm:$0xff]  ;;  %v198_v6 = vld [vmem:[%s1029_s6 + $0x20] sm:$0xff]  ;;  %v199_v8 = vld [vmem:[%s1029_s6 + $0x28] sm:$0xff]  ;;  %s620_s5 = scalar_lea.hbm %s1221_s3, %s764_s30  ;;  %s621_s7 = sshll.u32 %s1118_s28, 4  ;;  %s622_s7 = int_to_ptr.vmem [resolvable:$true] %s621_s7 }
  0x2c   : > { %280 = vmatpush.msra.mxu0 %v210_v1  ;;  %766 = vmatpush.msra.mxu3 %v210_v1  ;;  %v206_v7 = vld [vmem:[%s1029_s6 + $0x60] sm:$0xff]  ;;  %v207_v9 = vld [vmem:[%s1029_s6 + $0x68] sm:$0xff]  ;;  %v200_v10 = vld [vmem:[%s1029_s6 + $0x30] sm:$0xff]  ;;  %s623_s8 = sshll.u32 %s620_s5, 4  ;;  %s608_s9 = scalar_lea.sflag [#allocation4], %s1025_s29  ;;  %s624_s8 = int_to_ptr.hbm [resolvable:$true] %s623_s8 }
  0x2d   : > { %707 = vmatmul.msk.f32.vlgmr.msra.gmra.mxu0 %vm216_vm0, %v194_v2  ;;  %719 = vmatmul.msk.f32.vlgmr.msra.gmra.mxu3 %vm216_vm0, %v206_v7  ;;  %v208_v11 = vld [vmem:[%s1029_s6 + $0x70] sm:$0xff]  ;;  %v201_v12 = vld [vmem:[%s1029_s6 + $0x38] sm:$0xff]  ;;  %v202_v14 = vld [vmem:[%s1029_s6 + $0x40] sm:$0xff]  ;;  %s861_s23 = sshra.s32 %s624_s8, 4  ;;  %s867_s17 = scalar_lea.hbm %s1221_s3, 512  ;;  %s862_s23 = int_to_ptr.hbm [resolvable:$true] %s861_s23 }
  0x2e   : > { %v209_v13 = vld [vmem:[%s1029_s6 + $0x78] sm:$0xff]  ;;  %v203_v15 = vld [vmem:[%s1029_s6 + $0x48] sm:$0xff]  ;;  %v204_v16 = vld [vmem:[%s1029_s6 + $0x50] sm:$0xff]  ;;  %s863_s10 = scalar_lea.hbm %s862_s23, 256  ;;  %p868_p0 = scmp.lt.s32.totalorder %s862_s23, %s1221_s3 }
  0x2f   : > { %v205_v17 = vld [vmem:[%s1029_s6 + $0x58] sm:$0xff]  ;;  %v212_v20 = vld [vmem:[%s1219_s1] sm:$0xff]  ;;  %v213_v22 = vld [vmem:[%s1219_s1 + $0x8] sm:$0xff]  ;;  %p864_p6 = scmp.ne.s32.totalorder %s862_s23, %s863_s10  ;;  %p869_p1 = scmp.lt.s32.totalorder %s867_s17, %s863_s10 }
  0x30   : > { %v214_v24 = vld [vmem:[%s1219_s1 + $0x10] sm:$0xff]  ;;  %v215_v26 = vld [vmem:[%s1219_s1 + $0x18] sm:$0xff] }
  0x31   : > { %p865_p9 = pnand %p864_p6, %p989_p11  ;;  %p870_p3 = por %p869_p1, %p868_p0 }
  0x33   : > { %p866_p13 = pneg %p865_p9 }
  0x35   : > { %708 = vmatmul.msk.f32.gmra.mxu0 %vm216_vm0, %v195_v3  ;;  %720 = vmatmul.msk.f32.gmra.mxu3 %vm216_vm0, %v207_v9  ;;  %p871_p4 = pnand %p870_p3, %p866_p13 }
  0x3d   : > { %709 = vmatmul.msk.f32.gmra.mxu0 %vm216_vm0, %v196_v4  ;;  %721 = vmatmul.msk.f32.gmra.mxu3 %vm216_vm0, %v208_v11 }
  0x45   : > { %710 = vmatmul.msk.f32.gmra.mxu0 %vm216_vm0, %v197_v5  ;;  %722 = vmatmul.msk.f32.gmra.mxu3 %vm216_vm0, %v209_v13 }
  0x4d   : > { %711 = vmatmul.msk.f32.gmra.mxu0 %vm216_vm0, %v198_v6 }
  0x55   : > { %712 = vmatmul.msk.f32.gmra.mxu0 %vm216_vm0, %v199_v8 }
  0x5d   : > { %713 = vmatmul.msk.f32.gmra.mxu0 %vm216_vm0, %v200_v10 }
  0x65   : > { %714 = vmatmul.msk.f32.gmra.mxu0 %vm216_vm0, %v201_v12 }
  0x6d   : > { %715 = vmatmul.msk.f32.gmra.mxu0 %vm216_vm0, %v202_v14 }
  0x75   : > { %716 = vmatmul.msk.f32.gmra.mxu0 %vm216_vm0, %v203_v15 }
  0x7d   : > { %717 = vmatmul.msk.f32.gmra.mxu0 %vm216_vm0, %v204_v16 }
  0x85   : > { %718 = vmatmul.msk.f32.gmra.mxu0 %vm216_vm0, %v205_v17 }
  0xaa   : > { %v282_v18 = vpop.f32.mrf.mxu0 }
  0xb0   : > { %v318_v28 = vpop.f32.mrf.mxu3 }
  0xb2   : > { %v285_v19 = vpop.f32.mrf.mxu0 }
  0xb3   : > { %356 = vmatpush.msra.mxu1 %v285_v19 }
  0xb5   : > { %357 = vmatpush.msra.mxu1 %v282_v18 }
  0xb6   : > { %723 = vmatmul.msk.f32.vlgmr.msra.gmra.mxu1 %vm216_vm0, %v212_v20 }
  0xb8   : > { %v321_v30 = vpop.f32.mrf.mxu3 }
  0xba   : > { %v288_v21 = vpop.f32.mrf.mxu0 }
  0xbe   : > { %724 = vmatmul.msk.f32.gmra.mxu1 %vm216_vm0, %v213_v22 }
  0xc0   : > { %v324_v32 = vpop.f32.mrf.mxu3 }
  0xc2   : > { %v291_v23 = vpop.f32.mrf.mxu0 }
  0xc3   : > { %385 = vmatpush.msra.mxu2 %v291_v23 }
  0xc5   : > { %386 = vmatpush.msra.mxu2 %v288_v21 }
  0xc6   : > { %727 = vmatmul.msk.f32.vlgmr.msra.gmra.mxu2 %vm216_vm0, %v212_v20  ;;  %725 = vmatmul.msk.f32.gmra.mxu1 %vm216_vm0, %v214_v24 }
  0xc8   : > { %v327_v35 = vpop.f32.mrf.mxu3 }
  0xca   : > { %v294_v25 = vpop.f32.mrf.mxu0 }
  0xce   : > { %728 = vmatmul.msk.f32.gmra.mxu2 %vm216_vm0, %v213_v22  ;;  %726 = vmatmul.msk.f32.gmra.mxu1 %vm216_vm0, %v215_v26 }
  0xd2   : > { %v297_v27 = vpop.f32.mrf.mxu0 }
  0xd3   : > { %414 = vmatpush.msrb.mxu3 %v297_v27 }
  0xd5   : > { %415 = vmatpush.msrb.mxu3 %v294_v25 }
  0xd6   : > { %729 = vmatmul.msk.f32.gmra.mxu2 %vm216_vm0, %v214_v24  ;;  %731 = vmatmul.msk.f32.vlgmr.msrb.gmra.mxu3 %vm216_vm0, %v212_v20 }
  0xda   : > { %v300_v29 = vpop.f32.mrf.mxu0 }
  0xde   : > { %730 = vmatmul.msk.f32.gmra.mxu2 %vm216_vm0, %v215_v26  ;;  %732 = vmatmul.msk.f32.gmra.mxu3 %vm216_vm0, %v213_v22 }
  0xe2   : > { %v303_v31 = vpop.f32.mrf.mxu0 }
  0xe3   : > { %443 = vmatpush.msrb.mxu1 %v303_v31 }
  0xe5   : > { %444 = vmatpush.msrb.mxu1 %v300_v29 }
  0xe6   : > { %733 = vmatmul.msk.f32.gmra.mxu3 %vm216_vm0, %v214_v24  ;;  %735 = vmatmul.msk.f32.vlgmr.msrb.gmra.mxu1 %vm216_vm0, %v212_v20 }
  0xe7   : > { %530 = vmatpush.msra.mxu1 %v321_v30 }
  0xe9   : > { %531 = vmatpush.msra.mxu1 %v318_v28 }
  0xea   : > { %v306_v33 = vpop.f32.mrf.mxu0 }
  0xee   : > { %734 = vmatmul.msk.f32.gmra.mxu3 %vm216_vm0, %v215_v26  ;;  %736 = vmatmul.msk.f32.gmra.mxu1 %vm216_vm0, %v213_v22 }
  0xf2   : > { %v309_v34 = vpop.f32.mrf.mxu0 }
  0xf3   : > { %472 = vmatpush.msrb.mxu2 %v309_v34 }
  0xf5   : > { %473 = vmatpush.msrb.mxu2 %v306_v33 }
  0xf6   : > { %739 = vmatmul.msk.f32.vlgmr.msrb.gmra.mxu2 %vm216_vm0, %v212_v20  ;;  %737 = vmatmul.msk.f32.gmra.mxu1 %vm216_vm0, %v214_v24 }
  0xf7   : > { %559 = vmatpush.msra.mxu2 %v327_v35 }
  0xf9   : > { %560 = vmatpush.msra.mxu2 %v324_v32 }
  0xfa   : > { %v312_v36 = vpop.f32.mrf.mxu0 }
  0xfe   : > { %740 = vmatmul.msk.f32.gmra.mxu2 %vm216_vm0, %v213_v22  ;;  %738 = vmatmul.msk.f32.gmra.mxu1 %vm216_vm0, %v215_v26 }
 0x102   : > { %v315_v37 = vpop.f32.mrf.mxu0 }
 0x103   : > { %501 = vmatpush.msra.mxu3 %v315_v37 }
 0x105   : > { %502 = vmatpush.msra.mxu3 %v312_v36 }
 0x106   : > { %743 = vmatmul.msk.f32.vlgmr.msra.gmra.mxu3 %vm216_vm0, %v212_v20  ;;  %741 = vmatmul.msk.f32.gmra.mxu2 %vm216_vm0, %v214_v24 }
 0x107   : > { %747 = vmatmul.msk.f32.vlgmr.msra.gmra.mxu1 %vm216_vm0, %v212_v20 }
 0x10e   : > { %744 = vmatmul.msk.f32.gmra.mxu3 %vm216_vm0, %v213_v22  ;;  %742 = vmatmul.msk.f32.gmra.mxu2 %vm216_vm0, %v215_v26 }
 0x10f   : > { %748 = vmatmul.msk.f32.gmra.mxu1 %vm216_vm0, %v213_v22 }
 0x116   : > { %745 = vmatmul.msk.f32.gmra.mxu3 %vm216_vm0, %v214_v24  ;;  %751 = vmatmul.msk.f32.vlgmr.msra.gmra.mxu2 %vm216_vm0, %v212_v20 }
 0x117   : > { %749 = vmatmul.msk.f32.gmra.mxu1 %vm216_vm0, %v214_v24 }
 0x11e   : > { %746 = vmatmul.msk.f32.gmra.mxu3 %vm216_vm0, %v215_v26  ;;  %752 = vmatmul.msk.f32.gmra.mxu2 %vm216_vm0, %v213_v22 }
 0x11f   : > { %750 = vmatmul.msk.f32.gmra.mxu1 %vm216_vm0, %v215_v26 }
 0x126   : > { %753 = vmatmul.msk.f32.gmra.mxu2 %vm216_vm0, %v214_v24 }
 0x12e   : > { %754 = vmatmul.msk.f32.gmra.mxu2 %vm216_vm0, %v215_v26 }
 0x133   : > { %v359_v38 = vpop.f32.mrf.mxu1 }
 0x134   : > { %575 = vst.msk [vmem:[%s1118_s28] sm:$0xff] %vm574_vm1, %v359_v38 }
 0x13b   : > { %v362_v39 = vpop.f32.mrf.mxu1 }
 0x13c   : > { %576 = vst.msk [vmem:[%s1118_s28 + $0x8] sm:$0xff] %vm574_vm1, %v362_v39 }
 0x143   : > { %v365_v40 = vpop.f32.mrf.mxu1 }
 0x144   : > { %577 = vst.msk [vmem:[%s1118_s28 + $0x10] sm:$0xff] %vm574_vm1, %v365_v40 }
 0x149   : > { %v388_v41 = vpop.f32.mrf.mxu2 }
 0x14a   : > { %579 = vst.msk [vmem:[%s1118_s28 + $0x20] sm:$0xff] %vm574_vm1, %v388_v41 }
 0x14b   : > { %v368_v42 = vpop.f32.mrf.mxu1 }
 0x14c   : > { %578 = vst.msk [vmem:[%s1118_s28 + $0x18] sm:$0xff] %vm574_vm1, %v368_v42 }
 0x151   : > { %v391_v43 = vpop.f32.mrf.mxu2 }
 0x152   : > { %580 = vst.msk [vmem:[%s1118_s28 + $0x28] sm:$0xff] %vm574_vm1, %v391_v43 }
 0x159   : > { %v394_v44 = vpop.f32.mrf.mxu2  ;;  %v417_v45 = vpop.f32.mrf.mxu3 }
 0x15a   : > { %581 = vst.msk [vmem:[%s1118_s28 + $0x30] sm:$0xff] %vm574_vm1, %v394_v44 }
 0x15b   : > { %583 = vst.msk [vmem:[%s1118_s28 + $0x40] sm:$0xff] %vm574_vm1, %v417_v45 }
 0x161   : > { %v397_v46 = vpop.f32.mrf.mxu2  ;;  %v420_v47 = vpop.f32.mrf.mxu3 }
 0x162   : > { %582 = vst.msk [vmem:[%s1118_s28 + $0x38] sm:$0xff] %vm574_vm1, %v397_v46 }
 0x163   : > { %584 = vst.msk [vmem:[%s1118_s28 + $0x48] sm:$0xff] %vm574_vm1, %v420_v47  ;;  %v446_v48 = vpop.f32.mrf.mxu1 }
 0x164   : > { %587 = vst.msk [vmem:[%s1118_s28 + $0x60] sm:$0xff] %vm574_vm1, %v446_v48 }
 0x169   : > { %v423_v49 = vpop.f32.mrf.mxu3 }
 0x16a   : > { %585 = vst.msk [vmem:[%s1118_s28 + $0x50] sm:$0xff] %vm574_vm1, %v423_v49 }
 0x16b   : > { %v449_v50 = vpop.f32.mrf.mxu1 }
 0x16c   : > { %588 = vst.msk [vmem:[%s1118_s28 + $0x68] sm:$0xff] %vm574_vm1, %v449_v50 }
 0x171   : > { %v426_v51 = vpop.f32.mrf.mxu3 }
 0x172   : > { %586 = vst.msk [vmem:[%s1118_s28 + $0x58] sm:$0xff] %vm574_vm1, %v426_v51 }
 0x173   : > { %v452_v52 = vpop.f32.mrf.mxu1 }
 0x174   : > { %589 = vst.msk [vmem:[%s1118_s28 + $0x70] sm:$0xff] %vm574_vm1, %v452_v52 }
 0x179   : > { %v475_v53 = vpop.f32.mrf.mxu2 }
 0x17a   : > { %591 = vst.msk [vmem:[%s1118_s28 + $0x80] sm:$0xff] %vm574_vm1, %v475_v53 }
 0x17b   : > { %v455_v54 = vpop.f32.mrf.mxu1 }
 0x17c   : > { %590 = vst.msk [vmem:[%s1118_s28 + $0x78] sm:$0xff] %vm574_vm1, %v455_v54 }
 0x181   : > { %v478_v55 = vpop.f32.mrf.mxu2 }
 0x182   : > { %592 = vst.msk [vmem:[%s1118_s28 + $0x88] sm:$0xff] %vm574_vm1, %v478_v55 }
 0x184   : > { %v533_v56 = vpop.f32.mrf.mxu1 }
 0x185   : > { %599 = vst.msk [vmem:[%s1118_s28 + $0xc0] sm:$0xff] %vm574_vm1, %v533_v56 }
 0x189   : > { %v504_v57 = vpop.f32.mrf.mxu3  ;;  %v481_v58 = vpop.f32.mrf.mxu2 }
 0x18a   : > { %595 = vst.msk [vmem:[%s1118_s28 + $0xa0] sm:$0xff] %vm574_vm1, %v504_v57 }
 0x18b   : > { %593 = vst.msk [vmem:[%s1118_s28 + $0x90] sm:$0xff] %vm574_vm1, %v481_v58 }
 0x18c   : > { %v536_v59 = vpop.f32.mrf.mxu1 }
 0x18d   : > { %600 = vst.msk [vmem:[%s1118_s28 + $0xc8] sm:$0xff] %vm574_vm1, %v536_v59 }
 0x191   : > { %v507_v60 = vpop.f32.mrf.mxu3  ;;  %v484_v61 = vpop.f32.mrf.mxu2 }
 0x192   : > { %596 = vst.msk [vmem:[%s1118_s28 + $0xa8] sm:$0xff] %vm574_vm1, %v507_v60 }
 0x193   : > { %594 = vst.msk [vmem:[%s1118_s28 + $0x98] sm:$0xff] %vm574_vm1, %v484_v61 }
 0x194   : > { %v539_v62 = vpop.f32.mrf.mxu1 }
 0x195   : > { %601 = vst.msk [vmem:[%s1118_s28 + $0xd0] sm:$0xff] %vm574_vm1, %v539_v62 }
 0x199   : > { %v510_v63 = vpop.f32.mrf.mxu3  ;;  %v562_v0 = vpop.f32.mrf.mxu2 }
 0x19a   : > { %597 = vst.msk [vmem:[%s1118_s28 + $0xb0] sm:$0xff] %vm574_vm1, %v510_v63 }
 0x19b   : > { %603 = vst.msk [vmem:[%s1118_s28 + $0xe0] sm:$0xff] %vm574_vm1, %v562_v0 }
 0x19c   : > { %v542_v1 = vpop.f32.mrf.mxu1 }
 0x19d   : > { %602 = vst.msk [vmem:[%s1118_s28 + $0xd8] sm:$0xff] %vm574_vm1, %v542_v1 }
 0x1a1   : > { %v513_v2 = vpop.f32.mrf.mxu3  ;;  %v565_v3 = vpop.f32.mrf.mxu2 }
 0x1a2   : > { %598 = vst.msk [vmem:[%s1118_s28 + $0xb8] sm:$0xff] %vm574_vm1, %v513_v2 }
 0x1a3   : > { %604 = vst.msk [vmem:[%s1118_s28 + $0xe8] sm:$0xff] %vm574_vm1, %v565_v3 }
 0x1a9   : > { %v568_v4 = vpop.f32.mrf.mxu2 }
 0x1aa   : > { %605 = vst.msk [vmem:[%s1118_s28 + $0xf0] sm:$0xff] %vm574_vm1, %v568_v4 }
 0x1b1   : > { %v571_v5 = vpop.f32.mrf.mxu2 }
 0x1b2   : > { %606 = vst.msk [vmem:[%s1118_s28 + $0xf8] sm:$0xff] %vm574_vm1, %v571_v5 }
 0x1b3   : > { %874 = shalt.err (!%p871_p4)
}
 0x1b4   : > { %s917_s29 = smov 128   ;;  %s918_s22 = smov 8  }
 0x1b5   : > { %769 = dma.vmem_to_hbm [thread:$0]  (%p989_p11), %s622_s7, 4096, %s624_s8, %s608_s9, %s917_s29, %s917_s29, %s918_s22  }
 0x1b6 PF: > { %s638_s27 = sand.u32 1, %s901_s12   ;;  %p1227_p7 = scmp.ge.s32.totalorder %s913_s15, 2 }
 0x1b7   : > { %s639_s26 = scalar_lea.sflag [#allocation4], %s638_s27 }
 0x1b8   : > { %p776_p5 = pnand %p1227_p7, %p993_p12 }
 0x1ba   : > { %p777_p8 = pneg %p776_p5 }
 0x1bc   : > { %896 = dma.done.wait (%p777_p8), %s639_s26, 4096  }
 0x1bd   : > { %898 = vsyncadd (%p777_p8), %s639_s26, 4294963200  ;;  %p16_p10 = scmp.ge.s32.totalorder %s964_s18, 4   ;;  %s1228_s12 = smov %s905_s13 }
 0x1be   : > { %s1229_s13 = smov %s909_s14  ;;  %s1230_s14 = smov %s976_s21 }
 0x1bf   : > { %s1231_s15 = smov %s964_s18  ;;  %18 = sbr.rel (!%p16_p10) target bundleno = 5 (0x5), region = 77 }
 0x1c4   :  { %645 = vsyncpa [#allocation3], 1 }
 0x1c5   :  { %647 = vsyncpa [#allocation3 + $0x1], 1 }
 0x1c6   :  { %648 = vsyncpa [#allocation4], 1 }
 0x1c7   :  { %650 = vsyncpa [#allocation4 + $0x1], 1 }

</bundles_post_ra>
